<compile_context>
chip_gen: v6e
topology: v6e:2x2x1
jax: 0.10.0
libtpu: 0.0.40
codegen_flags: <defaults>
</compile_context>

<pallas_src>
import functools
import math

import jax
import jax.numpy as jnp
from jax.experimental import pallas as pl
from jax.experimental.pallas import tpu as pltpu

_VMEM_LIMIT_BYTES = 32 * 1024 * 1024   # safe on v5e/v6e (128 MiB) and v7x (64 MiB)
_MXU_DTYPE = jnp.bfloat16              # MXU operand dtype; accumulation is f32


def _choose_tile(dim, preferred, align):
    """Full dim if it is small; else the largest `align`-multiple divisor <= preferred."""
    if dim <= preferred:
        return dim
    t = (preferred // align) * align
    while t >= align:
        if dim % t == 0:
            return t
        t -= align
    return dim  # fallback: full extent (always legal)


# ---------------------------------------------------------------------------
# Tiled matmul + bias (+ optional ReLU)
# ---------------------------------------------------------------------------

def _matmul_kernel(x_ref, w_ref, b_ref, o_ref, acc_ref, *, activation, mxu_dtype):
    k = pl.program_id(2)

    @pl.when(k == 0)
    def _init():
        acc_ref[...] = jnp.zeros_like(acc_ref)

    acc_ref[...] += jnp.dot(
        x_ref[...].astype(mxu_dtype),
        w_ref[...].astype(mxu_dtype),
        preferred_element_type=jnp.float32,
    )

    @pl.when(k == pl.num_programs(2) - 1)
    def _fin():
        out = acc_ref[...] + b_ref[...].astype(jnp.float32)
        if activation == "relu":
            out = jnp.maximum(out, 0.0)
        o_ref[...] = out.astype(o_ref.dtype)


def matmul_bias(x, w, b, *, activation=None, out_dtype=None,
                tm=256, tn=256, tk=512, mxu_dtype=_MXU_DTYPE):
    """o = x @ w + b  with w stored (Din, Dout) (already transposed)."""
    M, K = x.shape
    K2, N = w.shape
    assert K == K2
    out_dtype = x.dtype if out_dtype is None else out_dtype
    tm = _choose_tile(M, tm, 8)
    tn = _choose_tile(N, tn, 128)
    tk = _choose_tile(K, tk, 128)
    grid = (M // tm, N // tn, K // tk)
    kernel = functools.partial(_matmul_kernel, activation=activation, mxu_dtype=mxu_dtype)
    return pl.pallas_call(
        kernel,
        grid=grid,
        in_specs=[
            pl.BlockSpec((tm, tk), lambda i, j, k: (i, k)),
            pl.BlockSpec((tk, tn), lambda i, j, k: (k, j)),
            pl.BlockSpec((1, tn), lambda i, j, k: (0, j)),
        ],
        out_specs=pl.BlockSpec((tm, tn), lambda i, j, k: (i, j)),
        out_shape=jax.ShapeDtypeStruct((M, N), out_dtype),
        scratch_shapes=[pltpu.VMEM((tm, tn), jnp.float32)],
        compiler_params=pltpu.CompilerParams(
            dimension_semantics=("parallel", "parallel", "arbitrary"),
            vmem_limit_bytes=_VMEM_LIMIT_BYTES,
        ),
    )(x, w, b.reshape(1, N))


# ---------------------------------------------------------------------------
# Tiled matmul + bias + residual-add + LayerNorm fused epilogue
# (used for out-proj -> LN1 and FFN linear2 -> LN2; needs full Dout per row)
# ---------------------------------------------------------------------------

def _matmul_res_ln_kernel(x_ref, w_ref, b_ref, res_ref, g_ref, bt_ref,
                          o_ref, acc_ref, *, eps, mxu_dtype):
    k = pl.program_id(1)

    @pl.when(k == 0)
    def _init():
        acc_ref[...] = jnp.zeros_like(acc_ref)

    acc_ref[...] += jnp.dot(
        x_ref[...].astype(mxu_dtype),
        w_ref[...].astype(mxu_dtype),
        preferred_element_type=jnp.float32,
    )

    @pl.when(k == pl.num_programs(1) - 1)
    def _fin():
        z = (acc_ref[...] + b_ref[...].astype(jnp.float32)
             + res_ref[...].astype(jnp.float32))
        mu = jnp.mean(z, axis=-1, keepdims=True)
        var = jnp.mean((z - mu) ** 2, axis=-1, keepdims=True)
        zn = (z - mu) * jax.lax.rsqrt(var + eps)
        o_ref[...] = (zn * g_ref[...].astype(jnp.float32)
                      + bt_ref[...].astype(jnp.float32)).astype(o_ref.dtype)


def matmul_bias_residual_ln(x, w, b, res, gamma, beta, *, eps=1e-5, out_dtype=None,
                            tm=256, tk=512, mxu_dtype=_MXU_DTYPE):
    """o = LayerNorm(res + x @ w + b) (w stored (Din, Dout)); N is not tiled (LN row)."""
    M, K = x.shape
    K2, N = w.shape
    assert K == K2 and res.shape == (M, N)
    out_dtype = res.dtype if out_dtype is None else out_dtype
    tm = _choose_tile(M, tm, 8)
    tk = _choose_tile(K, tk, 128)
    grid = (M // tm, K // tk)
    kernel = functools.partial(_matmul_res_ln_kernel, eps=eps, mxu_dtype=mxu_dtype)
    return pl.pallas_call(
        kernel,
        grid=grid,
        in_specs=[
            pl.BlockSpec((tm, tk), lambda i, k: (i, k)),
            pl.BlockSpec((tk, N), lambda i, k: (k, 0)),
            pl.BlockSpec((1, N), lambda i, k: (0, 0)),
            pl.BlockSpec((tm, N), lambda i, k: (i, 0)),
            pl.BlockSpec((1, N), lambda i, k: (0, 0)),
            pl.BlockSpec((1, N), lambda i, k: (0, 0)),
        ],
        out_specs=pl.BlockSpec((tm, N), lambda i, k: (i, 0)),
        out_shape=jax.ShapeDtypeStruct((M, N), out_dtype),
        scratch_shapes=[pltpu.VMEM((tm, N), jnp.float32)],
        compiler_params=pltpu.CompilerParams(
            dimension_semantics=("parallel", "arbitrary"),
            vmem_limit_bytes=_VMEM_LIMIT_BYTES,
        ),
    )(x, w, b.reshape(1, N), res, gamma.reshape(1, N), beta.reshape(1, N))


# ---------------------------------------------------------------------------
# Flash-style attention: grid (B*H, Sq//tq, Skv//tk), online softmax in VMEM
# ---------------------------------------------------------------------------

def _flash_attn_kernel(q_ref, k_ref, v_ref, o_ref, m_ref, l_ref, acc_ref, *, scale):
    ki = pl.program_id(2)

    @pl.when(ki == 0)
    def _init():
        m_ref[...] = jnp.full(m_ref.shape, -jnp.inf, dtype=m_ref.dtype)
        l_ref[...] = jnp.zeros_like(l_ref)
        acc_ref[...] = jnp.zeros_like(acc_ref)

    q = q_ref[0]
    k = k_ref[0]
    v = v_ref[0]
    # contract head_dim without transposing k (dot_general consumes stored layout)
    s = jax.lax.dot_general(q, k, (((1,), (1,)), ((), ())),
                            preferred_element_type=jnp.float32) * scale
    m_prev = m_ref[...]
    m_new = jnp.maximum(m_prev, jnp.max(s, axis=-1, keepdims=True))
    alpha = jnp.exp(m_prev - m_new)
    p = jnp.exp(s - m_new)
    l_ref[...] = alpha * l_ref[...] + jnp.sum(p, axis=-1, keepdims=True)
    acc_ref[...] = alpha * acc_ref[...] + jnp.dot(
        p.astype(v.dtype), v, preferred_element_type=jnp.float32)
    m_ref[...] = m_new

    @pl.when(ki == pl.num_programs(2) - 1)
    def _fin():
        o_ref[0] = (acc_ref[...] * pl.reciprocal(l_ref[...], approx=True)
                    ).astype(o_ref.dtype)


def flash_attention(q, k, v, *, tq=256, tkv=256):
    """q, k, v: (B*H, S, head_dim) -> (B*H, S, head_dim)."""
    BH, Sq, hd = q.shape
    _, Skv, _ = k.shape
    scale = 1.0 / math.sqrt(hd)
    tq = _choose_tile(Sq, tq, 8)
    tkv = _choose_tile(Skv, tkv, 8)
    grid = (BH, Sq // tq, Skv // tkv)
    kernel = functools.partial(_flash_attn_kernel, scale=scale)
    return pl.pallas_call(
        kernel,
        grid=grid,
        in_specs=[
            pl.BlockSpec((1, tq, hd), lambda b, qi, ki: (b, qi, 0)),
            pl.BlockSpec((1, tkv, hd), lambda b, qi, ki: (b, ki, 0)),
            pl.BlockSpec((1, tkv, hd), lambda b, qi, ki: (b, ki, 0)),
        ],
        out_specs=pl.BlockSpec((1, tq, hd), lambda b, qi, ki: (b, qi, 0)),
        out_shape=jax.ShapeDtypeStruct((BH, Sq, hd), q.dtype),
        scratch_shapes=[
            pltpu.VMEM((tq, 1), jnp.float32),   # m (running max)
            pltpu.VMEM((tq, 1), jnp.float32),   # l (running denom)
            pltpu.VMEM((tq, hd), jnp.float32),  # acc
        ],
        compiler_params=pltpu.CompilerParams(
            dimension_semantics=("parallel", "parallel", "arbitrary"),
            vmem_limit_bytes=_VMEM_LIMIT_BYTES,
        ),
    )(q, k, v)


# ---------------------------------------------------------------------------
# Encoder layer (post-norm, norm_first=False, relu, eval mode)
# ---------------------------------------------------------------------------

def transformer_encoder_layer(x, params, nhead, pos=None):
    """x: (S, B, D).  Reproduces TransformerEncoderLayer.forward (eval mode, no masks)."""
    S, B, D = x.shape
    H = nhead
    hd = D // H
    M = S * B
    x2d = x.reshape(M, D)

    # --- self-attention block: fused QKV projection ---
    if pos is None:
        qkv = matmul_bias(x2d, params["w_qkv"], params["b_qkv"], out_dtype=_MXU_DTYPE)
        q2d, k2d, v2d = qkv[:, :D], qkv[:, D:2 * D], qkv[:, 2 * D:]
    else:
        qk_in = (x + pos).reshape(M, D)
        qk = matmul_bias(qk_in, params["w_qkv"][:, :2 * D], params["b_qkv"][:2 * D],
                         out_dtype=_MXU_DTYPE)
        q2d, k2d = qk[:, :D], qk[:, D:]
        v2d = matmul_bias(x2d, params["w_qkv"][:, 2 * D:], params["b_qkv"][2 * D:],
                          out_dtype=_MXU_DTYPE)

    def to_heads(t):  # (S*B, D) -> (B*H, S, hd)   (host-side layout plumbing)
        return t.reshape(S, B, H, hd).transpose(1, 2, 0, 3).reshape(B * H, S, hd)

    attn = flash_attention(to_heads(q2d), to_heads(k2d), to_heads(v2d))   # (B*H, S, hd)
    attn2d = attn.reshape(B, H, S, hd).transpose(2, 0, 1, 3).reshape(M, D)

    # x1 = LayerNorm1(x + out_proj(attn))   [dropout1 = identity in eval]
    x1 = matmul_bias_residual_ln(attn2d, params["w_out"], params["b_out"],
                                 x2d, params["ln1_g"], params["ln1_b"],
                                 out_dtype=x.dtype)

    # h = relu(linear1(x1))                  [dropout = identity in eval]
    h = matmul_bias(x1, params["w1"], params["b1"], activation="relu",
                    out_dtype=_MXU_DTYPE)

    # x2 = LayerNorm2(x1 + linear2(h))       [dropout2 = identity in eval]
    x2 = matmul_bias_residual_ln(h, params["w2"], params["b2"],
                                 x1, params["ln2_g"], params["ln2_b"],
                                 out_dtype=x.dtype)
    return x2.reshape(S, B, D)


def transformer_encoder(x, layer_params_list, nhead, pos=None):
    out = x
    for p in layer_params_list:
        out = transformer_encoder_layer(out, p, nhead, pos=pos)
    return out


# ---------------------------------------------------------------------------
# Parameters: torch layout -> kernel layout (pre-transposed, bf16 weights)
# ---------------------------------------------------------------------------

def make_params(key, d_model, nhead, dim_feedforward):
    """PyTorch-layout parameters (as nn.TransformerEncoderLayer stores them)."""
    ks = jax.random.split(key, 8)
    scale = 0.02
    return {
        "in_proj_w": scale * jax.random.normal(ks[0], (3 * d_model, d_model), jnp.float32),
        "in_proj_b": scale * jax.random.normal(ks[1], (3 * d_model,), jnp.float32),
        "out_proj_w": scale * jax.random.normal(ks[2], (d_model, d_model), jnp.float32),
        "out_proj_b": scale * jax.random.normal(ks[3], (d_model,), jnp.float32),
        "w1": scale * jax.random.normal(ks[4], (dim_feedforward, d_model), jnp.float32),
        "b1": scale * jax.random.normal(ks[5], (dim_feedforward,), jnp.float32),
        "w2": scale * jax.random.normal(ks[6], (d_model, dim_feedforward), jnp.float32),
        "b2": scale * jax.random.normal(ks[7], (d_model,), jnp.float32),
        "ln1_g": jnp.ones((d_model,), jnp.float32),
        "ln1_b": jnp.zeros((d_model,), jnp.float32),
        "ln2_g": jnp.ones((d_model,), jnp.float32),
        "ln2_b": jnp.zeros((d_model,), jnp.float32),
    }


def prepare_params(p):
    """One-time conversion: transpose weights to (Din, Dout) and cast them to bf16."""
    return {
        "w_qkv": p["in_proj_w"].T.astype(_MXU_DTYPE),    # (D, 3D)
        "b_qkv": p["in_proj_b"],
        "w_out": p["out_proj_w"].T.astype(_MXU_DTYPE),   # (D, D)
        "b_out": p["out_proj_b"],
        "w1": p["w1"].T.astype(_MXU_DTYPE),              # (D, DFF)
        "b1": p["b1"],
        "w2": p["w2"].T.astype(_MXU_DTYPE),              # (DFF, D)
        "b2": p["b2"],
        "ln1_g": p["ln1_g"], "ln1_b": p["ln1_b"],
        "ln2_g": p["ln2_g"], "ln2_b": p["ln2_b"],
    }


# ---------------------------------------------------------------------------
# Pure-JAX f32 reference (matches the PyTorch eval-mode forward)
# ---------------------------------------------------------------------------

def reference_encoder_layer(x, p, nhead, pos=None, eps=1e-5):
    S, B, D = x.shape
    H = nhead
    hd = D // H
    qk_in = x if pos is None else x + pos
    wq, wk, wv = jnp.split(p["in_proj_w"], 3, axis=0)
    bq, bk, bv = jnp.split(p["in_proj_b"], 3, axis=0)
    q = qk_in @ wq.T + bq
    k = qk_in @ wk.T + bk
    v = x @ wv.T + bv

    def heads(t):  # (S,B,D) -> (B,H,S,hd)
        return t.reshape(S, B, H, hd).transpose(1, 2, 0, 3)

    qh, kh, vh = heads(q), heads(k), heads(v)
    s = jnp.einsum("bhqd,bhkd->bhqk", qh, kh) / math.sqrt(hd)
    prob = jax.nn.softmax(s, axis=-1)
    o = jnp.einsum("bhqk,bhkd->bhqd", prob, vh).transpose(2, 0, 1, 3).reshape(S, B, D)
    sa = o @ p["out_proj_w"].T + p["out_proj_b"]

    def ln(z, g, b):
        mu = z.mean(-1, keepdims=True)
        var = ((z - mu) ** 2).mean(-1, keepdims=True)
        return (z - mu) / jnp.sqrt(var + eps) * g + b

    x1 = ln(x + sa, p["ln1_g"], p["ln1_b"])
    h = jnp.maximum(x1 @ p["w1"].T + p["b1"], 0.0)
    ff = h @ p["w2"].T + p["b2"]
    return ln(x1 + ff, p["ln2_g"], p["ln2_b"])


def reference_encoder(x, torch_params_list, nhead, pos=None):
    out = x
    for p in torch_params_list:
        out = reference_encoder_layer(out, p, nhead, pos=pos)
    return out


# ---------------------------------------------------------------------------

if __name__ == "__main__":
    S, B, D, H, DFF = 8, 2, 32, 4, 64
    NUM_LAYERS = 2
    key = jax.random.PRNGKey(0)
    kx, kp = jax.random.split(key)
    x = jax.random.normal(kx, (S, B, D), jnp.float32)   # (seq, batch, d_model)

    layer_keys = jax.random.split(kp, NUM_LAYERS)
    torch_params = [make_params(k, D, H, DFF) for k in layer_keys]
    kernel_params = [prepare_params(p) for p in torch_params]

    out = transformer_encoder(x, kernel_params, nhead=H, pos=None)
    out = jax.block_until_ready(out)
    assert out.shape == (S, B, D)

    ref = reference_encoder(x, torch_params, nhead=H, pos=None)
    err = float(jnp.max(jnp.abs(out.astype(jnp.float32) - ref)))
    assert err < 5e-2, f"max abs error vs reference: {err}"
    print("KERNEL_OK")
</pallas_src>

<mosaic_0001>
module attributes {stable_mosaic.version = 11 : i64} {
  func.func @_matmul_kernel(%arg0: i32, %arg1: i32, %arg2: i32, %arg3: memref<16x32xf32, #tpu.memory_space<vmem>>, %arg4: memref<32x96xbf16, #tpu.memory_space<vmem>>, %arg5: memref<1x96xf32, #tpu.memory_space<vmem>>, %arg6: memref<16x96xbf16, #tpu.memory_space<vmem>>, %arg7: memref<16x96xf32, #tpu.memory_space<vmem>>) attributes {dimension_semantics = [#tpu.dimension_semantics<parallel>, #tpu.dimension_semantics<parallel>, #tpu.dimension_semantics<arbitrary>], iteration_bounds = array<i64: 1, 1, 1>, scalar_prefetch = 0 : i64, scratch_operands = 1 : i64, tpu.core_type = #tpu.core_type<tc>, window_params = [{transform_indices = @transform_0, window_bounds = array<i64: 16, 32>}, {transform_indices = @transform_1, window_bounds = array<i64: 32, 96>}, {transform_indices = @transform_2, window_bounds = array<i64: 1, 96>}, {transform_indices = @transform_3, window_bounds = array<i64: 16, 96>}]} {
    %c0_i32 = arith.constant 0 : i32
    %0 = arith.cmpi eq, %arg2, %c0_i32 : i32
    %1 = arith.extui %0 : i1 to i32
    %c0_i32_0 = arith.constant 0 : i32
    %2 = arith.cmpi ne, %1, %c0_i32_0 : i32
    scf.if %2 {
      %cst_10 = arith.constant 0.000000e+00 : f32
      %13 = vector.broadcast %cst_10 : f32 to vector<16x96xf32>
      %c0_11 = arith.constant 0 : index
      %c0_12 = arith.constant 0 : index
      %14 = vector.load %arg7[%c0_11, %c0_12] : memref<16x96xf32, #tpu.memory_space<vmem>>, vector<16x96xf32>
      tpu.vector_store %arg7[%c0_11, %c0_12], %13 {strides = array<i32>} : memref<16x96xf32, #tpu.memory_space<vmem>>, vector<16x96xf32>,
    } else {
    }
    %c0 = arith.constant 0 : index
    %c0_1 = arith.constant 0 : index
    %3 = vector.load %arg7[%c0, %c0_1] : memref<16x96xf32, #tpu.memory_space<vmem>>, vector<16x96xf32>
    %c0_2 = arith.constant 0 : index
    %c0_3 = arith.constant 0 : index
    %4 = vector.load %arg3[%c0_2, %c0_3] : memref<16x32xf32, #tpu.memory_space<vmem>>, vector<16x32xf32>
    %5 = arith.truncf %4 : vector<16x32xf32> to vector<16x32xbf16>
    %c0_4 = arith.constant 0 : index
    %c0_5 = arith.constant 0 : index
    %6 = vector.load %arg4[%c0_4, %c0_5] : memref<32x96xbf16, #tpu.memory_space<vmem>>, vector<32x96xbf16>
    %cst = arith.constant dense<0.000000e+00> : vector<16x96xf32>
    %7 = tpu.matmul %5, %6, %cst {dimension_numbers = #tpu.dot_dimension_numbers<[1], [0], [0], [1], [0, 0, 1, 1], [], []>} : vector<16x32xbf16>, vector<32x96xbf16>, vector<16x96xf32> -> vector<16x96xf32>
    %8 = arith.addf %3, %7 : vector<16x96xf32>
    %c0_6 = arith.constant 0 : index
    %c0_7 = arith.constant 0 : index
    %9 = vector.load %arg7[%c0_6, %c0_7] : memref<16x96xf32, #tpu.memory_space<vmem>>, vector<16x96xf32>
    tpu.vector_store %arg7[%c0_6, %c0_7], %8 {strides = array<i32>} : memref<16x96xf32, #tpu.memory_space<vmem>>, vector<16x96xf32>,
    %c0_i32_8 = arith.constant 0 : i32
    %10 = arith.cmpi eq, %arg2, %c0_i32_8 : i32
    %11 = arith.extui %10 : i1 to i32
    %c0_i32_9 = arith.constant 0 : i32
    %12 = arith.cmpi ne, %11, %c0_i32_9 : i32
    scf.if %12 {
      %c0_10 = arith.constant 0 : index
      %c0_11 = arith.constant 0 : index
      %13 = vector.load %arg7[%c0_10, %c0_11] : memref<16x96xf32, #tpu.memory_space<vmem>>, vector<16x96xf32>
      %c0_12 = arith.constant 0 : index
      %c0_13 = arith.constant 0 : index
      %14 = vector.load %arg5[%c0_12, %c0_13] : memref<1x96xf32, #tpu.memory_space<vmem>>, vector<1x96xf32>
      %15 = vector.broadcast %14 : vector<1x96xf32> to vector<16x96xf32>
      %16 = arith.addf %13, %15 : vector<16x96xf32>
      %17 = arith.truncf %16 : vector<16x96xf32> to vector<16x96xbf16>
      %c0_14 = arith.constant 0 : index
      %c0_15 = arith.constant 0 : index
      %18 = vector.load %arg6[%c0_14, %c0_15] : memref<16x96xbf16, #tpu.memory_space<vmem>>, vector<16x96xbf16>
      tpu.vector_store %arg6[%c0_14, %c0_15], %17 {strides = array<i32>} : memref<16x96xbf16, #tpu.memory_space<vmem>>, vector<16x96xbf16>,
    } else {
    }
    return
  }
  func.func @transform_0(%arg0: i32, %arg1: i32, %arg2: i32) -> (i32, i32) {
    %c0_i32 = arith.constant 0 : i32
    return %arg0, %arg2 : i32, i32
  }
  func.func @transform_1(%arg0: i32, %arg1: i32, %arg2: i32) -> (i32, i32) {
    %c0_i32 = arith.constant 0 : i32
    return %arg2, %arg1 : i32, i32
  }
  func.func @transform_2(%arg0: i32, %arg1: i32, %arg2: i32) -> (i32, i32) {
    %c0_i32 = arith.constant 0 : i32
    %c0_i32_0 = arith.constant 0 : i32
    return %c0_i32, %arg1 : i32, i32
  }
  func.func @transform_3(%arg0: i32, %arg1: i32, %arg2: i32) -> (i32, i32) {
    %c0_i32 = arith.constant 0 : i32
    return %arg0, %arg1 : i32, i32
  }
}

</mosaic_0001>

<bundles_post_ra>
// kernel: tpu_custom_call.1
= control target key start
LH: loop header
LB: loop body
LE: loop exit
PB: predicated region body
PF: predicated region fallthrough
CT: control target
= control target key end

     0   :  { %8 = vsyncpa [#allocation4], 0  ;;  %s312_s0 = inlined_call_operand.hbm [shape: f32[16,32], index: 0, kind: input, shape index: {}]   ;;  %s313_s1 = inlined_call_operand.hbm [shape: bf16[32,96], index: 1, kind: input, shape index: {}]   ;;  %s314_s2 = inlined_call_operand.vmem [shape: f32[1,96], index: 2, kind: input, shape index: {}]   ;;  %s315_s3 = inlined_call_operand.hbm [shape: bf16[16,96], index: 3, kind: output, shape index: {}]  }
   0x1   :  { %9 = vsyncpa [#allocation7], 0 }
   0x2   :  { %10 = vsyncpa [#allocation5], 0  ;;  %s261_s12 = smov [#allocation3]  }
   0x3   :  { %s16_s13 = sshll.u32 %s261_s12, 4  ;;  %s17_s13 = int_to_ptr.vmem [resolvable:$true] %s16_s13 }
   0x4   :  { %s203_s14 = scalar_lea.vmem %s17_s13, 256  ;;  %p208_p1 = scmp.lt.s32.totalorder %s17_s13, %s17_s13 }
   0x5   :  { %p204_p0 = scmp.ne.s32.totalorder %s17_s13, %s203_s14  ;;  %p209_p2 = scmp.lt.s32.totalorder %s203_s14, %s203_s14 }
   0x7   :  { %p210_p3 = por %p209_p2, %p208_p1 }
   0x9   :  { %p211_p4 = pnand %p210_p3, %p204_p0 }
   0xb   :  { %214 = shalt.err (!%p211_p4)
}
   0xc   :  { %s262_s15 = smov 128   ;;  %s263_s16 = smov 8  }
   0xd   :  { %22 = dma.hbm_to_vmem [thread:$0]  %s312_s0, 256, %s17_s13, [#allocation4], %s262_s15, %s262_s15, %s263_s16  }
   0xe   :  { %s264_s19 = smov [#allocation6]  }
   0xf   :  { %s28_s20 = sshll.u32 %s264_s19, 4  ;;  %s29_s20 = int_to_ptr.vmem [resolvable:$true] %s28_s20 }
  0x10   :  { %s223_s21 = scalar_lea.vmem %s29_s20, 256  ;;  %p228_p6 = scmp.lt.s32.totalorder %s29_s20, %s29_s20 }
  0x11   :  { %p224_p5 = scmp.ne.s32.totalorder %s29_s20, %s223_s21  ;;  %p229_p7 = scmp.lt.s32.totalorder %s223_s21, %s223_s21 }
  0x13   :  { %p230_p8 = por %p229_p7, %p228_p6 }
  0x15   :  { %p231_p9 = pnand %p230_p8, %p224_p5 }
  0x17   :  { %234 = shalt.err (!%p231_p9)
}
  0x18   :  { %s265_s22 = smov 64   ;;  %s266_s23 = smov 4  }
  0x19   :  { %34 = dma.hbm_to_vmem [thread:$0]  %s313_s1, 256, %s29_s20, [#allocation7], %s265_s22, %s265_s22, %s266_s23  }
  0x1a   :  { %255 = dma.done.wait [#allocation4], 256  }
  0x1b   :  { %256 = vsyncadd [#allocation4], 4294967040 }
  0x1c   :  { %257 = dma.done.wait [#allocation7], 256  }
  0x1d   :  { %258 = vsyncadd [#allocation7], 4294967040  ;;  %vm48_vm0 = vcmask 785408   ;;  %v267_v0 = vmov 0.0   ;;  %vm268_vm1 = vmmov 0   ;;  %v193_v1 = vld [vmem:[#allocation6 + $0x8] sm:$0xff]  }
  0x1e   :  { %49 = vst.msk [vmem:[#allocation2] sm:$0xff] %vm48_vm0, %v267_v0  ;;  %50 = vst.msk [vmem:[#allocation2 + $0x8] sm:$0xff] %vm48_vm0, %v267_v0  ;;  %176 = vmatprep.subr.bf16.mxu0 %v267_v0  ;;  %180 = vmatprep.mubr.msk.bf16.mxu0 %vm268_vm1, %v267_v0  ;;  %v194_v2 = vld [vmem:[#allocation6] sm:$0xff]   ;;  %v53_v3 = vld [vmem:[#allocation3] sm:$0xff]  ;;  %vm72_vm2 = vcmask 261120   ;;  %vm144_vm3 = vcmask 781312  }
  0x1f   :  { %177 = vmatpush3.bf16.msra.mxu0 %v193_v1  ;;  %v54_v4 = vld [vmem:[#allocation3 + $0x8] sm:$0xff]  ;;  %v168_v14 = vld [vmem:[%s314_s2] ss:$0 sm:$0xff]  ;;  %s269_s26 = smov [#allocation8]  }
  0x20   :  { %178 = vmatprep.subr.bf16.mxu0 %v267_v0  ;;  %v55_v5 = vpack.c.bf16 %v54_v4, %v53_v3  ;;  %s152_s27 = sshll.u32 %s269_s26, 4  ;;  %s153_s27 = int_to_ptr.vmem [resolvable:$true] %s152_s27 }
  0x21   :  { %s235_s28 = scalar_lea.vmem %s153_s27, 128  ;;  %p240_p11 = scmp.lt.s32.totalorder %s153_s27, %s153_s27 }
  0x22   :  { %p236_p10 = scmp.ne.s32.totalorder %s153_s27, %s235_s28  ;;  %p241_p12 = scmp.lt.s32.totalorder %s235_s28, %s235_s28 }
  0x23   :  { %179 = vmatpush3.bf16.msra.mxu0 %v194_v2 }
  0x24   :  { %p242_p13 = por %p241_p12, %p240_p11 }
  0x25   :  { %v51_v6 = vld [vmem:[#allocation2] sm:$0xff]  ;;  %v52_v10 = vld [vmem:[#allocation2 + $0x8] sm:$0xff] }
  0x26   :  { %181 = vmatmul.mubr.msk.bf16.vlgmr.msra.gmra.mxu0 %vm72_vm2, %v55_v5  ;;  %p243_p0 = pnand %p242_p13, %p236_p10 }
  0xe6   :  { %v110_v7 = vpop.f32.mrf.mxu0 }
  0xe7   :  { %v117_v8 = vadd.f32 %v110_v7, %v51_v6 }
  0xe8   :  { %v182_v9 = vpop.f32.mrf.mxu0 }
  0xe9   :  { %120 = vst.msk [vmem:[#allocation2] sm:$0xff] %vm48_vm0, %v117_v8 }
  0xea   :  { %v113_v11 = vpop.f32.mrf.mxu0 }
  0xeb   :  { %v118_v12 = vadd.f32 %v113_v11, %v52_v10 }
  0xec   :  { %v183_v13 = vpop.f32.mrf.mxu0 }
  0xed   :  { %121 = vst.msk [vmem:[#allocation2 + $0x8] sm:$0xff] %vm48_vm0, %v118_v12 }
  0xf0   :  { %v125_v15 = vld [vmem:[#allocation2] sm:$0xff] }
  0xf1   :  { %v134_v16 = vadd.f32 %v168_v14, %v125_v15 }
  0xf3   :  { %v171_v17 = vpack.c.bf16 %v134_v16, %v134_v16 }
  0xf4   :  { %v126_v18 = vld [vmem:[#allocation2 + $0x8] sm:$0xff] }
  0xf5   :  { %v135_v19 = vadd.f32 %v168_v14, %v126_v18  ;;  %145 = vst.msk [vmem:[#allocation8] sm:$0xf] %vm144_vm3, %v171_v17 }
  0xf7   :  { %v172_v20 = vpack.c.bf16 %v135_v19, %v135_v19 }
  0xf9   :  { %146 = vst.msk [vmem:[#allocation8 + $0x4] sm:$0xf] %vm144_vm3, %v172_v20 }
  0xfa   :  { %246 = shalt.err (!%p243_p0)
}
  0xfb   :  { %158 = dma.vmem_to_hbm [thread:$0]  %s153_s27, 128, %s315_s3, [#allocation5], %s265_s22, %s265_s22, %s266_s23  }
  0xfc   :  { %259 = dma.done.wait [#allocation5], 128  }
  0xfd   :  { %260 = vsyncadd [#allocation5], 4294967168 }
  0xfe   :  { %162 = vsyncpa [#allocation4], 1 }
  0xff   :  { %163 = vsyncpa [#allocation7], 1 }
 0x100   :  { %164 = vsyncpa [#allocation5], 1 }

</bundles_post_ra>
